<compile_context>
chip_gen: v7x
topology: tpu7x:2x2x1
jax: 0.10.0
libtpu: 0.0.40
codegen_flags: <defaults>
</compile_context>

<pallas_src>
import functools
import numpy as np
import jax
import jax.numpy as jnp
from jax.experimental import pallas as pl
from jax.experimental.pallas import tpu as pltpu


# ---------------------------------------------------------------- tiling helpers

def _round_up(x, m):
    return (x + m - 1) // m * m


def _tiles(dim, max_tile, align=1):
    """Return (tile, padded_dim) with padded_dim % tile == 0.

    If `dim` fits in one tile the block covers the whole (possibly sublane-padded)
    axis, which satisfies the TPU (8,128) block constraint; otherwise the tile is
    `max_tile` (chosen as a multiple of 128 / 8) and the axis is zero-padded."""
    if dim <= max_tile:
        p = _round_up(dim, align)
        return p, p
    return max_tile, _round_up(dim, max_tile)


def _pad_axis(x, axis, target):
    if x.shape[axis] == target:
        return x
    pads = [(0, 0)] * x.ndim
    pads[axis] = (0, target - x.shape[axis])
    return jnp.pad(x, pads)


# ---------------------------------------------------------------- tiled linear

def _matmul_kernel(*refs, act, has_bias, has_res):
    x_ref, w_ref = refs[0], refs[1]
    idx = 2
    b_ref = None
    r_ref = None
    if has_bias:
        b_ref = refs[idx]; idx += 1
    if has_res:
        r_ref = refs[idx]; idx += 1
    o_ref, acc_ref = refs[idx], refs[idx + 1]

    @pl.when(pl.program_id(2) == 0)
    def _():
        acc_ref[...] = jnp.zeros_like(acc_ref)

    acc_ref[...] += jnp.dot(x_ref[...].astype(jnp.float32),
                            w_ref[...].astype(jnp.float32),
                            preferred_element_type=jnp.float32)

    @pl.when(pl.program_id(2) == pl.num_programs(2) - 1)
    def _():
        y = acc_ref[...]
        if has_bias:
            y = y + b_ref[...].astype(jnp.float32)
        if act == "quick_gelu":                   # CLIP QuickGELU: x * sigmoid(1.702 x)
            y = y * jax.nn.sigmoid(1.702 * y)
        if has_res:
            y = y + r_ref[...].astype(jnp.float32)
        o_ref[...] = y.astype(o_ref.dtype)


def linear(x, w, b=None, act="none", residual=None,
           tm_max=256, tn_max=512, tk_max=512):
    """Tiled y = act(x @ w + b) [+ residual] with a K-reduction accumulator."""
    *lead, K = x.shape
    N = w.shape[1]
    x2 = x.reshape(-1, K)
    M = x2.shape[0]

    tm, Mp = _tiles(M, tm_max, 8)
    tn, Np = _tiles(N, tn_max)
    tk, Kp = _tiles(K, tk_max)

    x2 = _pad_axis(_pad_axis(x2, 0, Mp), 1, Kp)
    wp = _pad_axis(_pad_axis(w, 0, Kp), 1, Np)

    has_bias = b is not None
    has_res = residual is not None

    in_specs = [
        pl.BlockSpec((tm, tk), lambda i, j, k: (i, k)),
        pl.BlockSpec((tk, tn), lambda i, j, k: (k, j)),
    ]
    args = [x2, wp]
    if has_bias:
        in_specs.append(pl.BlockSpec((1, tn), lambda i, j, k: (0, j)))
        args.append(_pad_axis(b.reshape(1, N), 1, Np))
    if has_res:
        r2 = _pad_axis(_pad_axis(residual.reshape(-1, N), 0, Mp), 1, Np)
        in_specs.append(pl.BlockSpec((tm, tn), lambda i, j, k: (i, j)))
        args.append(r2)

    cost = pl.CostEstimate(
        flops=2 * M * N * K,
        transcendentals=M * N if act == "quick_gelu" else 0,
        bytes_accessed=4 * (M * K + K * N + 2 * M * N),
    )
    out = pl.pallas_call(
        functools.partial(_matmul_kernel, act=act,
                          has_bias=has_bias, has_res=has_res),
        grid=(Mp // tm, Np // tn, Kp // tk),
        in_specs=in_specs,
        out_specs=pl.BlockSpec((tm, tn), lambda i, j, k: (i, j)),
        out_shape=jax.ShapeDtypeStruct((Mp, Np), x.dtype),
        scratch_shapes=[pltpu.VMEM((tm, tn), jnp.float32)],
        compiler_params=pltpu.CompilerParams(
            dimension_semantics=("parallel", "parallel", "arbitrary")),
        cost_estimate=cost,
    )(*args)
    return out[:M, :N].reshape(*lead, N)


# ---------------------------------------------------------------- fused LN + linear

def _ln_matmul_kernel(*refs, act, has_bias, eps):
    x_ref, g_ref, bln_ref, w_ref = refs[:4]
    idx = 4
    b_ref = None
    if has_bias:
        b_ref = refs[idx]; idx += 1
    o_ref = refs[idx]

    x = x_ref[...].astype(jnp.float32)
    mu = jnp.mean(x, axis=-1, keepdims=True)
    var = jnp.mean(jnp.square(x - mu), axis=-1, keepdims=True)
    h = (x - mu) * jax.lax.rsqrt(var + eps)
    h = h * g_ref[...].astype(jnp.float32) + bln_ref[...].astype(jnp.float32)
    y = jnp.dot(h, w_ref[...].astype(jnp.float32),
                preferred_element_type=jnp.float32)
    if has_bias:
        y = y + b_ref[...].astype(jnp.float32)
    if act == "quick_gelu":
        y = y * jax.nn.sigmoid(1.702 * y)
    o_ref[...] = y.astype(o_ref.dtype)


def ln_linear(x, gamma, beta, w, b=None, act="none", eps=1e-5,
              tm_max=256, tn_max=512):
    """Fused LayerNorm(x) @ w (+b) (+QuickGELU).  The LN axis is kept whole so the
    statistics are exact; only M and N are tiled (both 'parallel')."""
    *lead, K = x.shape
    N = w.shape[1]
    x2 = x.reshape(-1, K)
    M = x2.shape[0]

    tm, Mp = _tiles(M, tm_max, 8)
    tn, Np = _tiles(N, tn_max)

    x2 = _pad_axis(x2, 0, Mp)
    wp = _pad_axis(w, 1, Np)

    has_bias = b is not None
    in_specs = [
        pl.BlockSpec((tm, K), lambda i, j: (i, 0)),
        pl.BlockSpec((1, K), lambda i, j: (0, 0)),
        pl.BlockSpec((1, K), lambda i, j: (0, 0)),
        pl.BlockSpec((K, tn), lambda i, j: (0, j)),
    ]
    args = [x2, gamma.reshape(1, K), beta.reshape(1, K), wp]
    if has_bias:
        in_specs.append(pl.BlockSpec((1, tn), lambda i, j: (0, j)))
        args.append(_pad_axis(b.reshape(1, N), 1, Np))

    cost = pl.CostEstimate(
        flops=2 * M * N * K + 8 * M * K,
        transcendentals=M * N if act == "quick_gelu" else M,
        bytes_accessed=4 * (M * K + K * N + M * N),
    )
    out = pl.pallas_call(
        functools.partial(_ln_matmul_kernel, act=act, has_bias=has_bias, eps=eps),
        grid=(Mp // tm, Np // tn),
        in_specs=in_specs,
        out_specs=pl.BlockSpec((tm, tn), lambda i, j: (i, j)),
        out_shape=jax.ShapeDtypeStruct((Mp, Np), x.dtype),
        compiler_params=pltpu.CompilerParams(
            dimension_semantics=("parallel", "parallel")),
        cost_estimate=cost,
    )(*args)
    return out[:M, :N].reshape(*lead, N)


# ---------------------------------------------------------------- standalone LN

def _layernorm_kernel(x_ref, g_ref, b_ref, o_ref, *, eps):
    x = x_ref[...].astype(jnp.float32)
    mu = jnp.mean(x, axis=-1, keepdims=True)
    var = jnp.mean(jnp.square(x - mu), axis=-1, keepdims=True)
    y = (x - mu) * jax.lax.rsqrt(var + eps)
    o_ref[...] = (y * g_ref[...] + b_ref[...]).astype(o_ref.dtype)


def layernorm(x, gamma, beta, eps=1e-5, tm_max=512):
    *lead, D = x.shape
    x2 = x.reshape(-1, D)
    M = x2.shape[0]
    tm, Mp = _tiles(M, tm_max, 8)
    x2 = _pad_axis(x2, 0, Mp)
    out = pl.pallas_call(
        functools.partial(_layernorm_kernel, eps=eps),
        grid=(Mp // tm,),
        in_specs=[
            pl.BlockSpec((tm, D), lambda i: (i, 0)),
            pl.BlockSpec((1, D), lambda i: (0, 0)),
            pl.BlockSpec((1, D), lambda i: (0, 0)),
        ],
        out_specs=pl.BlockSpec((tm, D), lambda i: (i, 0)),
        out_shape=jax.ShapeDtypeStruct((Mp, D), x.dtype),
        compiler_params=pltpu.CompilerParams(dimension_semantics=("parallel",)),
    )(x2, gamma.reshape(1, D), beta.reshape(1, D))
    return out[:M].reshape(*lead, D)


# ---------------------------------------------------------------- fused attention

def _attention_kernel(*refs, scale, use_mask):
    qkv_ref, wo_ref, bo_ref, res_ref = refs[:4]
    idx = 4
    mask_ref = None
    if use_mask:
        mask_ref = refs[idx]; idx += 1
    o_ref = refs[idx]

    q = qkv_ref[0, 0].astype(jnp.float32)          # (H, S, Dh)
    k = qkv_ref[0, 1].astype(jnp.float32)
    v = qkv_ref[0, 2].astype(jnp.float32)

    s = jnp.einsum("hqd,hkd->hqk", q, k,
                   preferred_element_type=jnp.float32) * scale
    if use_mask:
        s = s + mask_ref[...][None].astype(jnp.float32)
    m = jnp.max(s, axis=-1, keepdims=True)
    p = jnp.exp(s - m)
    l = jnp.sum(p, axis=-1, keepdims=True)         # (H, S, 1)
    o = jnp.einsum("hqk,hkd->hqd", p, v, preferred_element_type=jnp.float32)
    o = o * pl.reciprocal(l, approx=True)          # normalize after PV (S*Dh elems, EUP)
    # fused output projection: sum over heads of o_h @ Wo[h], + bias + residual.
    proj = jnp.einsum("hqd,hdn->hqn", o, wo_ref[...].astype(jnp.float32),
                      preferred_element_type=jnp.float32)
    y = (jnp.sum(proj, axis=0) + bo_ref[...].astype(jnp.float32)
         + res_ref[0].astype(jnp.float32))
    o_ref[0] = y.astype(o_ref.dtype)


def attention(qkv, out_w, out_b, residual, heads, mask=None):
    """All heads of one batch element per grid step; out-proj + residual fused."""
    B, S, D3 = qkv.shape
    D = D3 // 3
    H = heads
    Dh = D // H
    # single layout transform into head-major slabs (replaces the 3-way split +
    # per-tensor transposes of the original version).
    qkv_h = qkv.reshape(B, S, 3, H, Dh).transpose(0, 2, 3, 1, 4)   # (B,3,H,S,Dh)
    wo_h = out_w.reshape(H, Dh, D)
    bo = out_b.reshape(1, D)

    use_mask = mask is not None
    in_specs = [
        pl.BlockSpec((1, 3, H, S, Dh), lambda b: (b, 0, 0, 0, 0)),
        pl.BlockSpec((H, Dh, D), lambda b: (0, 0, 0)),
        pl.BlockSpec((1, D), lambda b: (0, 0)),
        pl.BlockSpec((1, S, D), lambda b: (b, 0, 0)),
    ]
    args = [qkv_h, wo_h, bo, residual]
    if use_mask:
        in_specs.append(pl.BlockSpec((S, S), lambda b: (0, 0)))
        args.append(mask.astype(jnp.float32))

    cost = pl.CostEstimate(
        flops=4 * B * H * S * S * Dh + 2 * B * S * D * D,
        transcendentals=B * H * S * S,
        bytes_accessed=4 * (qkv_h.size + wo_h.size + 2 * B * S * D),
    )
    return pl.pallas_call(
        functools.partial(_attention_kernel, scale=1.0 / float(np.sqrt(Dh)),
                          use_mask=use_mask),
        grid=(B,),
        in_specs=in_specs,
        out_specs=pl.BlockSpec((1, S, D), lambda b: (b, 0, 0)),
        out_shape=jax.ShapeDtypeStruct((B, S, D), qkv.dtype),
        compiler_params=pltpu.CompilerParams(dimension_semantics=("parallel",)),
        cost_estimate=cost,
    )(*args)


# ---------------------------------------------------------------- CLIP logits

def _clip_logits_kernel(img_ref, txt_ref, scale_ref, o_ref):
    img = img_ref[...].astype(jnp.float32)
    txt = txt_ref[...].astype(jnp.float32)
    img = img * jax.lax.rsqrt(
        jnp.maximum(jnp.sum(img * img, axis=-1, keepdims=True), 1e-12))
    txt = txt * jax.lax.rsqrt(
        jnp.maximum(jnp.sum(txt * txt, axis=-1, keepdims=True), 1e-12))
    scale = jnp.exp(scale_ref[0])
    logits = scale * jax.lax.dot_general(img, txt, (((1,), (1,)), ((), ())),
                                         preferred_element_type=jnp.float32)
    o_ref[...] = logits.astype(o_ref.dtype)


def clip_logits(image_features, text_features, logit_scale):
    B, D = image_features.shape
    C, _ = text_features.shape
    return pl.pallas_call(
        _clip_logits_kernel,
        grid=(1,),
        in_specs=[
            pl.BlockSpec((B, D), lambda i: (0, 0)),
            pl.BlockSpec((C, D), lambda i: (0, 0)),
            pl.BlockSpec(memory_space=pltpu.MemorySpace.SMEM),
        ],
        out_specs=pl.BlockSpec((B, C), lambda i: (0, 0)),
        out_shape=jax.ShapeDtypeStruct((B, C), jnp.float32),
    )(image_features, text_features, logit_scale)


# ---------------------------------------------------------------- model pieces

def transformer_block(x, blk, mask=None):
    # CLIP pre-LN residual attention block, fused:
    #   ln_1 + qkv-proj  ->  attention + out-proj + residual
    #   ln_2 + fc + gelu ->  c_proj + residual
    qkv = ln_linear(x, blk["ln1_g"], blk["ln1_b"], blk["qkv_w"], blk["qkv_b"])
    x = attention(qkv, blk["out_w"], blk["out_b"], residual=x,
                  heads=blk["heads"], mask=mask)
    h = ln_linear(x, blk["ln2_g"], blk["ln2_b"], blk["fc_w"], blk["fc_b"],
                  act="quick_gelu")
    x = linear(h, blk["cproj_w"], blk["cproj_b"], residual=x)
    return x


def encode_image(p, image):
    # "conv1" (patchify conv, stride=kernel=patch) as patch-extraction + matmul.
    B, C, H, W = image.shape
    ps = p["patch_size"]
    gh, gw = H // ps, W // ps
    patches = image.reshape(B, C, gh, ps, gw, ps)
    patches = patches.transpose(0, 2, 4, 1, 3, 5).reshape(B, gh * gw, C * ps * ps)
    x = linear(patches, p["patch_w"])                      # no bias (no fake-zero DMA)
    width = x.shape[-1]
    cls = jnp.broadcast_to(p["class_embedding"].reshape(1, 1, width), (B, 1, width))
    x = jnp.concatenate([cls, x], axis=1)
    x = x + p["pos_embed"][None]
    x = layernorm(x, p["ln_pre_g"], p["ln_pre_b"])
    for blk in p["blocks"]:
        x = transformer_block(x, blk, mask=None)           # vision: no attention mask
    # ln_post fused with the visual projection (LN is per-token, CLS only).
    feats = ln_linear(x[:, 0, :], p["ln_post_g"], p["ln_post_b"], p["proj"])
    return feats, x                                        # (features, tokens) tuple


def prompt_learner_forward(p):
    ctx = p["ctx"]
    if ctx.ndim == 2:                                      # generic context -> expand
        ctx = jnp.broadcast_to(ctx[None], (p["n_cls"],) + ctx.shape)
    # class_token_position == 'end'
    return jnp.concatenate([p["token_prefix"], ctx, p["token_suffix"]], axis=1)


def encode_text(p, prompts, tokenized_prompts):
    x = prompts + p["pos_embed"][None]
    S = x.shape[1]
    row = jnp.arange(S)[:, None]
    col = jnp.arange(S)[None, :]
    causal_mask = jnp.where(col > row, -1e9, 0.0).astype(jnp.float32)
    for blk in p["blocks"]:
        x = transformer_block(x, blk, mask=causal_mask)
    eot = jnp.argmax(tokenized_prompts, axis=-1)           # EOT token position
    x_eot = x[jnp.arange(x.shape[0]), eot]                 # (n_cls, D)
    # ln_final is per-token -> gather first, then fuse LN with text_projection.
    return ln_linear(x_eot, p["ln_final_g"], p["ln_final_b"], p["text_projection"])


def custom_clip_forward(params, image):
    image_features, _ = encode_image(params["visual"], image.astype(jnp.float32))
    prompts = prompt_learner_forward(params["prompt_learner"])
    text_features = encode_text(params["text"], prompts,
                                params["prompt_learner"]["tokenized_prompts"])
    return clip_logits(image_features, text_features, params["logit_scale"])


# ---------------------------------------------------------------- deterministic init

def _init_block(key, width, heads):
    ks = jax.random.split(key, 4)
    d = width
    return dict(
        heads=heads,
        ln1_g=jnp.ones((d,), jnp.float32), ln1_b=jnp.zeros((d,), jnp.float32),
        qkv_w=jax.random.normal(ks[0], (d, 3 * d), jnp.float32) * 0.02,
        qkv_b=jnp.zeros((3 * d,), jnp.float32),
        out_w=jax.random.normal(ks[1], (d, d), jnp.float32) * 0.02,
        out_b=jnp.zeros((d,), jnp.float32),
        ln2_g=jnp.ones((d,), jnp.float32), ln2_b=jnp.zeros((d,), jnp.float32),
        fc_w=jax.random.normal(ks[2], (d, 4 * d), jnp.float32) * 0.02,
        fc_b=jnp.zeros((4 * d,), jnp.float32),
        cproj_w=jax.random.normal(ks[3], (4 * d, d), jnp.float32) * 0.02,
        cproj_b=jnp.zeros((d,), jnp.float32),
    )


def init_params(key):
    # small synthetic CLIP config; feature dims chosen lane-dense (multiples of 128)
    img_size, in_ch, patch = 16, 3, 8
    width_v, layers_v, heads_v = 128, 2, 4
    ctx_dim, layers_t, heads_t = 128, 2, 4
    embed_dim = 128
    seq_len, n_ctx, n_cls = 8, 4, 3
    name_lens = [1, 2, 1]

    keys = jax.random.split(key, 16)
    n_patch = (img_size // patch) ** 2

    visual = dict(
        patch_size=patch,
        patch_w=jax.random.normal(keys[0], (in_ch * patch * patch, width_v), jnp.float32) * 0.02,
        class_embedding=jax.random.normal(keys[1], (width_v,), jnp.float32) * 0.02,
        pos_embed=jax.random.normal(keys[2], (n_patch + 1, width_v), jnp.float32) * 0.02,
        ln_pre_g=jnp.ones((width_v,), jnp.float32), ln_pre_b=jnp.zeros((width_v,), jnp.float32),
        blocks=[_init_block(k, width_v, heads_v) for k in jax.random.split(keys[3], layers_v)],
        ln_post_g=jnp.ones((width_v,), jnp.float32), ln_post_b=jnp.zeros((width_v,), jnp.float32),
        proj=jax.random.normal(keys[4], (width_v, embed_dim), jnp.float32) * 0.02,
    )

    text = dict(
        pos_embed=jax.random.normal(keys[5], (seq_len, ctx_dim), jnp.float32) * 0.02,
        blocks=[_init_block(k, ctx_dim, heads_t) for k in jax.random.split(keys[6], layers_t)],
        ln_final_g=jnp.ones((ctx_dim,), jnp.float32), ln_final_b=jnp.zeros((ctx_dim,), jnp.float32),
        text_projection=jax.random.normal(keys[7], (ctx_dim, embed_dim), jnp.float32) * 0.02,
    )

    # synthetic tokenized prompts: [SOT, ctx...ctx, name tokens, EOT, pad...]
    sot, eot = 49406, 49407
    tok = np.zeros((n_cls, seq_len), dtype=np.int32)
    for i, nl in enumerate(name_lens):
        tok[i, 0] = sot
        tok[i, 1:1 + n_ctx] = 400 + np.arange(n_ctx)
        tok[i, 1 + n_ctx:1 + n_ctx + nl] = 500 + np.arange(nl)
        tok[i, 1 + n_ctx + nl] = eot

    prompt_learner = dict(
        n_cls=n_cls,
        ctx=jax.random.normal(keys[8], (n_ctx, ctx_dim), jnp.float32) * 0.02,  # generic context
        token_prefix=jax.random.normal(keys[9], (n_cls, 1, ctx_dim), jnp.float32) * 0.02,
        token_suffix=jax.random.normal(keys[10], (n_cls, seq_len - 1 - n_ctx, ctx_dim),
                                       jnp.float32) * 0.02,
        tokenized_prompts=jnp.asarray(tok),
    )

    return dict(
        visual=visual,
        text=text,
        prompt_learner=prompt_learner,
        logit_scale=jnp.array([np.log(1.0 / 0.07)], jnp.float32),
    )


# ---------------------------------------------------------------- main

if __name__ == "__main__":
    key = jax.random.PRNGKey(0)
    pkey, ikey = jax.random.split(key)
    params = init_params(pkey)

    image = jax.random.normal(ikey, (2, 3, 16, 16), jnp.float32)   # NCHW

    logits = custom_clip_forward(params, image)
    logits = jax.block_until_ready(logits)

    assert logits.shape == (2, 3), logits.shape
    assert jnp.all(jnp.isfinite(logits))
    print("KERNEL_OK")
</pallas_src>

<mosaic_0001>
module attributes {stable_mosaic.version = 11 : i64} {
  func.func @_matmul_kernel(%arg0: i32, %arg1: i32, %arg2: i32, %arg3: memref<8x192xf32, #tpu.memory_space<vmem>>, %arg4: memref<192x128xf32, #tpu.memory_space<vmem>>, %arg5: memref<8x128xf32, #tpu.memory_space<vmem>>, %arg6: memref<8x128xf32, #tpu.memory_space<vmem>>) attributes {dimension_semantics = [#tpu.dimension_semantics<parallel>, #tpu.dimension_semantics<parallel>, #tpu.dimension_semantics<arbitrary>], iteration_bounds = array<i64: 1, 1, 1>, scalar_prefetch = 0 : i64, scratch_operands = 1 : i64, tpu.core_type = #tpu.core_type<tc>, window_params = [{transform_indices = @transform_0, window_bounds = array<i64: 8, 192>}, {transform_indices = @transform_1, window_bounds = array<i64: 192, 128>}, {transform_indices = @transform_2, window_bounds = array<i64: 8, 128>}]} {
    %c0_i32 = arith.constant 0 : i32
    %0 = arith.cmpi eq, %arg2, %c0_i32 : i32
    %1 = arith.extui %0 : i1 to i32
    %c0_i32_0 = arith.constant 0 : i32
    %2 = arith.cmpi ne, %1, %c0_i32_0 : i32
    scf.if %2 {
      %cst_10 = arith.constant 0.000000e+00 : f32
      %12 = vector.broadcast %cst_10 : f32 to vector<8x128xf32>
      %c0_11 = arith.constant 0 : index
      %c0_12 = arith.constant 0 : index
      %13 = vector.load %arg6[%c0_11, %c0_12] : memref<8x128xf32, #tpu.memory_space<vmem>>, vector<8x128xf32>
      tpu.vector_store %arg6[%c0_11, %c0_12], %12 {strides = array<i32>} : memref<8x128xf32, #tpu.memory_space<vmem>>, vector<8x128xf32>,
    } else {
    }
    %c0 = arith.constant 0 : index
    %c0_1 = arith.constant 0 : index
    %3 = vector.load %arg6[%c0, %c0_1] : memref<8x128xf32, #tpu.memory_space<vmem>>, vector<8x128xf32>
    %c0_2 = arith.constant 0 : index
    %c0_3 = arith.constant 0 : index
    %4 = vector.load %arg3[%c0_2, %c0_3] : memref<8x192xf32, #tpu.memory_space<vmem>>, vector<8x192xf32>
    %c0_4 = arith.constant 0 : index
    %c0_5 = arith.constant 0 : index
    %5 = vector.load %arg4[%c0_4, %c0_5] : memref<192x128xf32, #tpu.memory_space<vmem>>, vector<192x128xf32>
    %cst = arith.constant dense<0.000000e+00> : vector<8x128xf32>
    %6 = tpu.matmul %4, %5, %cst {dimension_numbers = #tpu.dot_dimension_numbers<[1], [0], [0], [1], [0, 0, 1, 1], [], []>} : vector<8x192xf32>, vector<192x128xf32>, vector<8x128xf32> -> vector<8x128xf32>
    %7 = arith.addf %3, %6 : vector<8x128xf32>
    %c0_6 = arith.constant 0 : index
    %c0_7 = arith.constant 0 : index
    %8 = vector.load %arg6[%c0_6, %c0_7] : memref<8x128xf32, #tpu.memory_space<vmem>>, vector<8x128xf32>
    tpu.vector_store %arg6[%c0_6, %c0_7], %7 {strides = array<i32>} : memref<8x128xf32, #tpu.memory_space<vmem>>, vector<8x128xf32>,
    %c0_i32_8 = arith.constant 0 : i32
    %9 = arith.cmpi eq, %arg2, %c0_i32_8 : i32
    %10 = arith.extui %9 : i1 to i32
    %c0_i32_9 = arith.constant 0 : i32
    %11 = arith.cmpi ne, %10, %c0_i32_9 : i32
    scf.if %11 {
      %c0_10 = arith.constant 0 : index
      %c0_11 = arith.constant 0 : index
      %12 = vector.load %arg6[%c0_10, %c0_11] : memref<8x128xf32, #tpu.memory_space<vmem>>, vector<8x128xf32>
      %c0_12 = arith.constant 0 : index
      %c0_13 = arith.constant 0 : index
      %13 = vector.load %arg5[%c0_12, %c0_13] : memref<8x128xf32, #tpu.memory_space<vmem>>, vector<8x128xf32>
      tpu.vector_store %arg5[%c0_12, %c0_13], %12 {strides = array<i32>} : memref<8x128xf32, #tpu.memory_space<vmem>>, vector<8x128xf32>,
    } else {
    }
    return
  }
  func.func @transform_0(%arg0: i32, %arg1: i32, %arg2: i32) -> (i32, i32) {
    %c0_i32 = arith.constant 0 : i32
    return %arg0, %arg2 : i32, i32
  }
  func.func @transform_1(%arg0: i32, %arg1: i32, %arg2: i32) -> (i32, i32) {
    %c0_i32 = arith.constant 0 : i32
    return %arg2, %arg1 : i32, i32
  }
  func.func @transform_2(%arg0: i32, %arg1: i32, %arg2: i32) -> (i32, i32) {
    %c0_i32 = arith.constant 0 : i32
    return %arg0, %arg1 : i32, i32
  }
}

</mosaic_0001>

<bundles_post_ra>
// kernel: tpu_custom_call.1
= control target key start
LH: loop header
LB: loop body
LE: loop exit
PB: predicated region body
PF: predicated region fallthrough
CT: control target
= control target key end

     0   :  { %7 = vsyncpa [#allocation4], 0  ;;  %s346_s0 = inlined_call_operand.hbm [shape: f32[8,192], index: 0, kind: input, shape index: {}]   ;;  %s347_s1 = inlined_call_operand.hbm [shape: f32[192,128], index: 1, kind: input, shape index: {}]   ;;  %s348_s2 = inlined_call_operand.hbm [shape: f32[8,128], index: 2, kind: output, shape index: {}]  }
   0x1   :  { %8 = vsyncpa [#allocation7], 0 }
   0x2   :  { %9 = vsyncpa [#allocation5], 0  ;;  %s282_s9 = smov [#allocation3]   ;;  %s283_s11 = smov [#allocation6]  }
   0x3   :  { %s16_s10 = sshll.u32 %s282_s9, 4  ;;  %s25_s12 = sshll.u32 %s283_s11, 4  ;;  %s17_s10 = int_to_ptr.vmem [resolvable:$true] %s16_s10  ;;  %s303_s12 = int_to_ptr.vmem [resolvable:$true] %s25_s12 }
   0x4   :  { %s210_s15 = scalar_lea.hbm %s346_s0, 256 }
   0x5   :  { %p211_p0 = scmp.ne.s32.totalorder %s346_s0, %s210_s15  ;;  %p214_p1 = scmp.lt.u32.totalorder %s210_s15, %s346_s0 }
   0x7   :  { %p216_p2 = pnand %p214_p1, %p211_p0 }
   0x9   :  { %219 = shalt.err (!%p216_p2)
}
   0xa   :  { %s220_s20 = scalar_lea.vmem %s17_s10, 256  ;;  %p225_p4 = scmp.lt.s32.totalorder %s17_s10, %s17_s10 }
   0xb   :  { %p221_p3 = scmp.ne.s32.totalorder %s17_s10, %s220_s20  ;;  %p226_p5 = scmp.lt.s32.totalorder %s220_s20, %s220_s20 }
   0xd   :  { %p227_p6 = por %p226_p5, %p225_p4 }
   0xf   :  { %p228_p7 = pnand %p227_p6, %p221_p3 }
  0x11   :  { %231 = shalt.err (!%p228_p7)
}
  0x12   :  { %19 = dma.hbm_to_vmem [thread:$0]  %s346_s0, 256, %s17_s10, [#allocation4]  }
  0x13   :  { %s232_s25 = scalar_lea.hbm %s347_s1, 3072 }
  0x14   :  { %p233_p8 = scmp.ne.s32.totalorder %s347_s1, %s232_s25  ;;  %p236_p9 = scmp.lt.u32.totalorder %s232_s25, %s347_s1 }
  0x16   :  { %p238_p10 = pnand %p236_p9, %p233_p8 }
  0x18   :  { %241 = shalt.err (!%p238_p10)
}
  0x19   :  { %s242_s30 = scalar_lea.vmem %s303_s12, 3072  ;;  %p247_p12 = scmp.lt.s32.totalorder %s303_s12, %s303_s12 }
  0x1a   :  { %p243_p11 = scmp.ne.s32.totalorder %s303_s12, %s242_s30  ;;  %p248_p13 = scmp.lt.s32.totalorder %s242_s30, %s242_s30 }
  0x1c   :  { %p249_p0 = por %p248_p13, %p247_p12 }
  0x1e   :  { %p250_p1 = pnand %p249_p0, %p243_p11 }
  0x20   :  { %253 = shalt.err (!%p250_p1)
}
  0x21   :  { %s284_s0 = smov 128   ;;  %s285_s3 = smov 8  }
  0x22   :  { %31 = dma.hbm_to_vmem [thread:$0]  %s347_s1, 3072, %s303_s12, [#allocation7], %s284_s0, %s284_s0, %s285_s3  }
  0x23   :  { %276 = dma.done.wait [#allocation4], 256  }
  0x24   :  { %277 = vsyncadd [#allocation4], 4294967040 }
  0x25   :  { %278 = dma.done.wait [#allocation7], 3072  }
  0x26   :  { %279 = vsyncadd [#allocation7], 4294964224  ;;  %v286_v0 = vmov 0.0|0.0   ;;  %v46_v1 = vld [vmem:[#allocation6] sm:$0xff]  ;;  %v47_v2 = vld [vmem:[#allocation6 + $0x8] sm:$0xff]  ;;  %vm70_vm0 = vcmask 523264  }
  0x27   :  { %168 = vmatprep.subr.bf16.mxu0 %v286_v0  ;;  %v48_v3 = vld [vmem:[#allocation6 + $0x10] sm:$0xff]  ;;  %v169_v4 = vpack.c.bf16 %v47_v2, %v46_v1  ;;  %v49_v5 = vld [vmem:[#allocation6 + $0x18] sm:$0xff]  ;;  %v50_v7 = vld [vmem:[#allocation6 + $0x20] sm:$0xff]  ;;  %s287_s1 = smov [#allocation8]  }
  0x28   :  { %v172_v6 = vpack.c.bf16 %v49_v5, %v48_v3  ;;  %v51_v8 = vld [vmem:[#allocation6 + $0x28] sm:$0xff]  ;;  %v52_v10 = vld [vmem:[#allocation6 + $0x30] sm:$0xff]  ;;  %v53_v11 = vld [vmem:[#allocation6 + $0x38] sm:$0xff]  ;;  %s157_s6 = sshll.u32 %s287_s1, 4  ;;  %s158_s6 = int_to_ptr.vmem [resolvable:$true] %s157_s6 }
  0x29   :  { %170 = vmatpush1.bf16.msra.mxu0 %v169_v4  ;;  %v175_v9 = vpack.c.bf16 %v51_v8, %v50_v7  ;;  %v45_v12 = vld [vmem:[#allocation3 + $0x8] sm:$0xff]  ;;  %v178_v13 = vpack.c.bf16 %v53_v11, %v52_v10  ;;  %v54_v14 = vld [vmem:[#allocation6 + $0x40] sm:$0xff]  ;;  %v55_v15 = vld [vmem:[#allocation6 + $0x48] sm:$0xff]  ;;  %s254_s7 = scalar_lea.vmem %s158_s6, 128  ;;  %p259_p3 = scmp.lt.s32.totalorder %s158_s6, %s158_s6 }
  0x2a   :  { %171 = vmatprep.subr.bf16.mxu0 %v286_v0  ;;  %167 = vmatprep.mubr.msk.f32.mxu0 %vm70_vm0, %v45_v12  ;;  %v181_v16 = vpack.c.bf16 %v55_v15, %v54_v14  ;;  %v56_v17 = vld [vmem:[#allocation6 + $0x50] sm:$0xff]  ;;  %v57_v18 = vld [vmem:[#allocation6 + $0x58] sm:$0xff]  ;;  %v58_v20 = vld [vmem:[#allocation6 + $0x60] sm:$0xff]  ;;  %p255_p2 = scmp.ne.s32.totalorder %s158_s6, %s254_s7  ;;  %p260_p4 = scmp.lt.s32.totalorder %s254_s7, %s254_s7 }
  0x2b   :  { %v184_v19 = vpack.c.bf16 %v57_v18, %v56_v17  ;;  %v59_v21 = vld [vmem:[#allocation6 + $0x68] sm:$0xff]  ;;  %v60_v23 = vld [vmem:[#allocation6 + $0x70] sm:$0xff]  ;;  %v61_v24 = vld [vmem:[#allocation6 + $0x78] sm:$0xff] }
  0x2c   :  { %v187_v22 = vpack.c.bf16 %v59_v21, %v58_v20  ;;  %v190_v25 = vpack.c.bf16 %v61_v24, %v60_v23  ;;  %v62_v26 = vld [vmem:[#allocation6 + $0x80] sm:$0xff]  ;;  %v63_v27 = vld [vmem:[#allocation6 + $0x88] sm:$0xff]  ;;  %v64_v29 = vld [vmem:[#allocation6 + $0x90] sm:$0xff]  ;;  %p261_p5 = por %p260_p4, %p259_p3 }
  0x2d   :  { %173 = vmatpush1.bf16.msra.mxu0 %v172_v6  ;;  %v193_v28 = vpack.c.bf16 %v63_v27, %v62_v26  ;;  %v65_v30 = vld [vmem:[#allocation6 + $0x98] sm:$0xff]  ;;  %v66_v32 = vld [vmem:[#allocation6 + $0xa0] sm:$0xff]  ;;  %v67_v33 = vld [vmem:[#allocation6 + $0xa8] sm:$0xff] }
  0x2e   :  { %174 = vmatprep.subr.bf16.mxu0 %v286_v0  ;;  %v196_v31 = vpack.c.bf16 %v65_v30, %v64_v29  ;;  %v199_v34 = vpack.c.bf16 %v67_v33, %v66_v32  ;;  %v68_v35 = vld [vmem:[#allocation6 + $0xb0] sm:$0xff]  ;;  %v69_v36 = vld [vmem:[#allocation6 + $0xb8] sm:$0xff]  ;;  %p262_p6 = pnand %p261_p5, %p255_p2 }
  0x2f   :  { %v202_v37 = vpack.c.bf16 %v69_v36, %v68_v35  ;;  %v44_v38 = vld [vmem:[#allocation3] sm:$0xff] }
  0x31   :  { %176 = vmatpush1.bf16.msra.mxu0 %v175_v9 }
  0x32   :  { %177 = vmatprep.subr.bf16.mxu0 %v286_v0 }
  0x35   :  { %179 = vmatpush1.bf16.msra.mxu0 %v178_v13 }
  0x36   :  { %180 = vmatprep.subr.bf16.mxu0 %v286_v0 }
  0x39   :  { %182 = vmatpush1.bf16.msra.mxu0 %v181_v16 }
  0x3a   :  { %183 = vmatprep.subr.bf16.mxu0 %v286_v0 }
  0x3d   :  { %185 = vmatpush1.bf16.msra.mxu0 %v184_v19 }
  0x3e   :  { %186 = vmatprep.subr.bf16.mxu0 %v286_v0 }
  0x41   :  { %188 = vmatpush1.bf16.msra.mxu0 %v187_v22 }
  0x42   :  { %189 = vmatprep.subr.bf16.mxu0 %v286_v0 }
  0x45   :  { %191 = vmatpush1.bf16.msra.mxu0 %v190_v25 }
  0x46   :  { %192 = vmatprep.subr.bf16.mxu0 %v286_v0 }
  0x49   :  { %194 = vmatpush1.bf16.msra.mxu0 %v193_v28 }
  0x4a   :  { %195 = vmatprep.subr.bf16.mxu0 %v286_v0 }
  0x4d   :  { %197 = vmatpush1.bf16.msra.mxu0 %v196_v31 }
  0x4e   :  { %198 = vmatprep.subr.bf16.mxu0 %v286_v0 }
  0x51   :  { %200 = vmatpush1.bf16.msra.mxu0 %v199_v34 }
  0x52   :  { %201 = vmatprep.subr.bf16.mxu0 %v286_v0 }
  0x55   :  { %203 = vmatpush1.bf16.msra.mxu0 %v202_v37 }
  0x58   :  { %139 = vmatmul.mubr.f32.vlgmr.msra.gmra.mrb[0].mxu0 %v44_v38 }
 0x12b   :  { %v140_v39 = vpop.f32.mrb[0].mxu0 }
 0x12c   :  { %150 = vst [vmem:[#allocation8] sm:$0xff] %v140_v39  ;;  %v142_v40 = vpop.f32.mrb[1].mxu0 }
 0x12d   :  { %265 = shalt.err (!%p262_p6)
}
 0x12e   :  { %s266_s10 = scalar_lea.hbm %s348_s2, 128 }
 0x12f   :  { %p267_p7 = scmp.ne.s32.totalorder %s348_s2, %s266_s10  ;;  %p270_p8 = scmp.lt.u32.totalorder %s266_s10, %s348_s2 }
 0x131   :  { %p272_p9 = pnand %p270_p8, %p267_p7 }
 0x133   :  { %275 = shalt.err (!%p272_p9)
}
 0x134   :  { %160 = dma.vmem_to_hbm [thread:$0]  %s158_s6, 128, %s348_s2, [#allocation5]  }
 0x135   :  { %280 = dma.done.wait [#allocation5], 128  }
 0x136   :  { %281 = vsyncadd [#allocation5], 4294967168 }
 0x137   :  { %164 = vsyncpa [#allocation4], 1 }
 0x138   :  { %165 = vsyncpa [#allocation7], 1 }
 0x139   :  { %166 = vsyncpa [#allocation5], 1 }

</bundles_post_ra>
